<compile_context>
chip_gen: v6e
topology: v6e:2x2x1
jax: 0.10.0
libtpu: 0.0.40
codegen_flags: <defaults>
</compile_context>

<pallas_src>
import functools

import jax
import jax.numpy as jnp
from jax.experimental import pallas as pl
from jax.experimental.pallas import tpu as pltpu


def attention_kernel(x_ref, wt_ref, b_ref, o_ref, acc_ref, *, inv_l):
    """One grid step over the length (L) axis.

    x_ref:   (B, C, TL)  current length tile of the input
    wt_ref:  (C, KP)     1x1-conv weight, transposed + lane-padded (resident)
    b_ref:   (1, KP)     bias, padded columns hold -1e30 (resident)
    o_ref:   (B, KP)     softmax output (written only on the last step)
    acc_ref: (B, C) f32  running sum over L (VMEM scratch, persists across steps)
    """
    l = pl.program_id(0)

    @pl.when(l == 0)
    def _init():
        acc_ref[...] = jnp.zeros_like(acc_ref)

    # Accumulate the partial sum over this length tile in f32 without
    # materializing a widened copy of the whole (B, C, TL) slab.
    acc_ref[...] += jnp.sum(x_ref[...], axis=-1, dtype=jnp.float32)

    @pl.when(l == pl.num_programs(0) - 1)
    def _finalize():
        pooled = acc_ref[...] * inv_l                          # mean over L, (B, C) f32
        logits = jnp.dot(pooled, wt_ref[...],
                         preferred_element_type=jnp.float32)   # (B, KP) on the MXU
        logits = logits + b_ref[...]
        m = jnp.max(logits, axis=-1, keepdims=True)
        e = jnp.exp(logits - m)                                # padded cols: exp(-1e30)=0
        denom = jnp.sum(e, axis=-1, keepdims=True)
        probs = e * pl.reciprocal(denom, approx=True)          # EUP reciprocal
        o_ref[...] = probs.astype(o_ref.dtype)


def _choose_length_tile(L, B, C, itemsize, max_tl=None,
                        per_buffer_budget_bytes=8 << 20):
    """Pick an L tile: multiple of 128 dividing L (or L itself), within budget."""
    if L % 128 != 0:
        return L  # small / odd L: single full-extent block
    for cand in (4096, 2048, 1024, 512, 256, 128):
        if max_tl is not None and cand > max_tl:
            continue
        if L % cand == 0 and B * C * cand * itemsize <= per_buffer_budget_bytes:
            return cand
    return 128


def attention_forward(x, conv_weight, conv_bias, *, max_length_tile=None):
    """x: (B, C, L); conv_weight: (K, C, 1); conv_bias: (K,). Returns (B, K)."""
    B, C, L = x.shape
    K = conv_weight.shape[0]
    KP = max(128, ((K + 127) // 128) * 128)     # lane-dense padded output width

    # Pre-transpose the 1x1-conv weight to (C, K) and pad K -> KP.
    wt = jnp.transpose(conv_weight[:, :, 0]).astype(jnp.float32)        # (C, K)
    wt_p = jnp.zeros((C, KP), jnp.float32).at[:, :K].set(wt)            # (C, KP)
    # Padded bias columns get a huge negative value so they vanish in the softmax.
    b_p = jnp.full((1, KP), -1e30, jnp.float32)
    b_p = b_p.at[0, :K].set(conv_bias.astype(jnp.float32))              # (1, KP)

    itemsize = jnp.dtype(x.dtype).itemsize
    TL = _choose_length_tile(L, B, C, itemsize, max_tl=max_length_tile)
    num_tiles = pl.cdiv(L, TL)   # L % TL == 0 by construction of _choose_length_tile

    # VMEM budget: double-buffered x tiles + resident weights/bias/out + accumulator.
    est = (2 * B * C * TL * itemsize
           + 2 * (C * KP + KP) * 4
           + 2 * B * KP * itemsize
           + B * C * 4)
    vmem_limit = int(min(48 * 1024 * 1024, max(4 * 1024 * 1024, 2 * est)))

    kernel = functools.partial(attention_kernel, inv_l=1.0 / L)

    out_p = pl.pallas_call(
        kernel,
        out_shape=jax.ShapeDtypeStruct((B, KP), x.dtype),
        grid_spec=pltpu.PrefetchScalarGridSpec(
            num_scalar_prefetch=0,
            grid=(num_tiles,),
            in_specs=[
                pl.BlockSpec((B, C, TL), lambda l: (0, 0, l)),   # streamed over L
                pl.BlockSpec((C, KP), lambda l: (0, 0)),         # resident weight
                pl.BlockSpec((1, KP), lambda l: (0, 0)),         # resident bias
            ],
            out_specs=pl.BlockSpec((B, KP), lambda l: (0, 0)),
            scratch_shapes=[pltpu.VMEM((B, C), jnp.float32)],
        ),
        compiler_params=pltpu.CompilerParams(
            dimension_semantics=("arbitrary",),   # reduction over L
            vmem_limit_bytes=vmem_limit,
        ),
        cost_estimate=pl.CostEstimate(
            flops=B * C * L + 2 * B * C * KP + 4 * B * KP,
            transcendentals=B * KP,
            bytes_accessed=B * C * L * itemsize + (C * KP + KP) * 4
                           + B * KP * itemsize,
        ),
    )(x, wt_p, b_p)

    return out_p[:, :K]


def attention_reference(x, conv_weight, conv_bias):
    pooled = jnp.mean(x, axis=-1)                                 # (B, C)
    logits = pooled @ conv_weight[:, :, 0].T + conv_bias          # (B, K)
    return jax.nn.softmax(logits, axis=-1)


if __name__ == "__main__":
    # Small deterministic setup consistent with the module:
    # in_planes (C) = 4, K = 4, batch B = 2, sequence length L = 16.
    B, C, L, K = 2, 4, 16, 4

    key = jax.random.PRNGKey(0)
    kx, kw, kb = jax.random.split(key, 3)

    x = jax.random.normal(kx, (B, C, L), dtype=jnp.float32)
    conv_weight = jax.random.normal(kw, (K, C, 1), dtype=jnp.float32) * 0.1
    conv_bias = jax.random.normal(kb, (K,), dtype=jnp.float32) * 0.1

    out = jax.block_until_ready(attention_forward(x, conv_weight, conv_bias))
    ref = attention_reference(x, conv_weight, conv_bias)
    assert out.shape == (B, K)
    assert jnp.allclose(out, ref, atol=2e-3, rtol=2e-3), "mismatch vs reference (small L)"
    assert jnp.allclose(jnp.sum(out, axis=1), 1.0, atol=2e-3), "softmax rows must sum to 1"

    # Longer sequence with a forced 256-wide tile: exercises the multi-step
    # pipelined L grid (init -> accumulate x4 -> finalize).
    L2 = 1024
    x2 = jax.random.normal(kx, (B, C, L2), dtype=jnp.float32)
    out2 = jax.block_until_ready(
        attention_forward(x2, conv_weight, conv_bias, max_length_tile=256))
    ref2 = attention_reference(x2, conv_weight, conv_bias)
    assert out2.shape == (B, K)
    assert jnp.allclose(out2, ref2, atol=2e-3, rtol=2e-3), "mismatch vs reference (tiled L)"
    assert jnp.allclose(jnp.sum(out2, axis=1), 1.0, atol=2e-3), "softmax rows must sum to 1"

    print("KERNEL_OK")
</pallas_src>

<mosaic_0001>
module attributes {stable_mosaic.version = 11 : i64} {
  func.func @attention_kernel(%arg0: i32, %arg1: memref<2x4x16xf32, #tpu.memory_space<vmem>>, %arg2: memref<4x128xf32, #tpu.memory_space<vmem>>, %arg3: memref<1x128xf32, #tpu.memory_space<vmem>>, %arg4: memref<2x128xf32, #tpu.memory_space<vmem>>, %arg5: memref<2x4xf32, #tpu.memory_space<vmem>>) attributes {dimension_semantics = [#tpu.dimension_semantics<arbitrary>], iteration_bounds = array<i64: 1>, scalar_prefetch = 0 : i64, scratch_operands = 1 : i64, tpu.core_type = #tpu.core_type<tc>, window_params = [{transform_indices = @transform_0, window_bounds = array<i64: 2, 4, 16>}, {pipeline_mode = #tpu.pipeline_mode<synchronous>, transform_indices = @transform_1, window_bounds = array<i64: 4, 128>}, {pipeline_mode = #tpu.pipeline_mode<synchronous>, transform_indices = @transform_2, window_bounds = array<i64: 1, 128>}, {pipeline_mode = #tpu.pipeline_mode<synchronous>, transform_indices = @transform_3, window_bounds = array<i64: 2, 128>}]} {
    %c0_i32 = arith.constant 0 : i32
    %0 = arith.cmpi eq, %arg0, %c0_i32 : i32
    %1 = arith.extui %0 : i1 to i32
    %c0_i32_0 = arith.constant 0 : i32
    %2 = arith.cmpi ne, %1, %c0_i32_0 : i32
    scf.if %2 {
      %cst_9 = arith.constant 0.000000e+00 : f32
      %11 = vector.broadcast %cst_9 : f32 to vector<2x4xf32>
      %c0_10 = arith.constant 0 : index
      %c0_11 = arith.constant 0 : index
      %12 = vector.load %arg5[%c0_10, %c0_11] : memref<2x4xf32, #tpu.memory_space<vmem>>, vector<2x4xf32>
      tpu.vector_store %arg5[%c0_10, %c0_11], %11 {strides = array<i32>} : memref<2x4xf32, #tpu.memory_space<vmem>>, vector<2x4xf32>,
    } else {
    }
    %c0 = arith.constant 0 : index
    %c0_1 = arith.constant 0 : index
    %3 = vector.load %arg5[%c0, %c0_1] : memref<2x4xf32, #tpu.memory_space<vmem>>, vector<2x4xf32>
    %c0_2 = arith.constant 0 : index
    %c0_3 = arith.constant 0 : index
    %c0_4 = arith.constant 0 : index
    %4 = vector.load %arg1[%c0_2, %c0_3, %c0_4] : memref<2x4x16xf32, #tpu.memory_space<vmem>>, vector<2x4x16xf32>
    %cst = arith.constant dense<0.000000e+00> : vector<2x4xf32>
    %5 = vector.multi_reduction <add>, %4, %cst [2] : vector<2x4x16xf32> to vector<2x4xf32>
    %6 = arith.addf %3, %5 : vector<2x4xf32>
    %c0_5 = arith.constant 0 : index
    %c0_6 = arith.constant 0 : index
    %7 = vector.load %arg5[%c0_5, %c0_6] : memref<2x4xf32, #tpu.memory_space<vmem>>, vector<2x4xf32>
    tpu.vector_store %arg5[%c0_5, %c0_6], %6 {strides = array<i32>} : memref<2x4xf32, #tpu.memory_space<vmem>>, vector<2x4xf32>,
    %c0_i32_7 = arith.constant 0 : i32
    %8 = arith.cmpi eq, %arg0, %c0_i32_7 : i32
    %9 = arith.extui %8 : i1 to i32
    %c0_i32_8 = arith.constant 0 : i32
    %10 = arith.cmpi ne, %9, %c0_i32_8 : i32
    scf.if %10 {
      %c0_9 = arith.constant 0 : index
      %c0_10 = arith.constant 0 : index
      %11 = vector.load %arg5[%c0_9, %c0_10] : memref<2x4xf32, #tpu.memory_space<vmem>>, vector<2x4xf32>
      %cst_11 = arith.constant 6.250000e-02 : f32
      %12 = vector.broadcast %cst_11 : f32 to vector<2x4xf32>
      %13 = arith.mulf %11, %12 : vector<2x4xf32>
      %c0_12 = arith.constant 0 : index
      %c0_13 = arith.constant 0 : index
      %14 = vector.load %arg2[%c0_12, %c0_13] : memref<4x128xf32, #tpu.memory_space<vmem>>, vector<4x128xf32>
      %cst_14 = arith.constant dense<0.000000e+00> : vector<2x128xf32>
      %15 = tpu.matmul %13, %14, %cst_14 {dimension_numbers = #tpu.dot_dimension_numbers<[1], [0], [0], [1], [0, 0, 1, 1], [], []>} : vector<2x4xf32>, vector<4x128xf32>, vector<2x128xf32> -> vector<2x128xf32>
      %c0_15 = arith.constant 0 : index
      %c0_16 = arith.constant 0 : index
      %16 = vector.load %arg3[%c0_15, %c0_16] : memref<1x128xf32, #tpu.memory_space<vmem>>, vector<1x128xf32>
      %17 = vector.broadcast %16 : vector<1x128xf32> to vector<2x128xf32>
      %18 = arith.addf %15, %17 : vector<2x128xf32>
      %cst_17 = arith.constant dense<0xFF800000> : vector<2xf32>
      %19 = vector.multi_reduction <maximumf>, %18, %cst_17 [1] : vector<2x128xf32> to vector<2xf32>
      %20 = vector.shape_cast %19 : vector<2xf32> to vector<2x1xf32>
      %21 = vector.broadcast %20 : vector<2x1xf32> to vector<2x128xf32>
      %22 = arith.subf %18, %21 : vector<2x128xf32>
      %23 = math.exp %22 : vector<2x128xf32>
      %cst_18 = arith.constant dense<0.000000e+00> : vector<2xf32>
      %24 = vector.multi_reduction <add>, %23, %cst_18 [1] : vector<2x128xf32> to vector<2xf32>
      %25 = vector.shape_cast %24 : vector<2xf32> to vector<2x1xf32>
      %26 = tpu.reciprocal %25 {approx = true} : vector<2x1xf32> -> vector<2x1xf32>
      %27 = vector.broadcast %26 : vector<2x1xf32> to vector<2x128xf32>
      %28 = arith.mulf %23, %27 : vector<2x128xf32>
      %c0_19 = arith.constant 0 : index
      %c0_20 = arith.constant 0 : index
      %29 = vector.load %arg4[%c0_19, %c0_20] : memref<2x128xf32, #tpu.memory_space<vmem>>, vector<2x128xf32>
      tpu.vector_store %arg4[%c0_19, %c0_20], %28 {strides = array<i32>} : memref<2x128xf32, #tpu.memory_space<vmem>>, vector<2x128xf32>,
    } else {
    }
    return
  }
  func.func @transform_0(%arg0: i32) -> (i32, i32, i32) {
    %c0_i32 = arith.constant 0 : i32
    %c0_i32_0 = arith.constant 0 : i32
    %c0_i32_1 = arith.constant 0 : i32
    return %c0_i32, %c0_i32_0, %arg0 : i32, i32, i32
  }
  func.func @transform_1(%arg0: i32) -> (i32, i32) {
    %c0_i32 = arith.constant 0 : i32
    %c0_i32_0 = arith.constant 0 : i32
    %c0_i32_1 = arith.constant 0 : i32
    return %c0_i32, %c0_i32_0 : i32, i32
  }
  func.func @transform_2(%arg0: i32) -> (i32, i32) {
    %c0_i32 = arith.constant 0 : i32
    %c0_i32_0 = arith.constant 0 : i32
    %c0_i32_1 = arith.constant 0 : i32
    return %c0_i32, %c0_i32_0 : i32, i32
  }
  func.func @transform_3(%arg0: i32) -> (i32, i32) {
    %c0_i32 = arith.constant 0 : i32
    %c0_i32_0 = arith.constant 0 : i32
    %c0_i32_1 = arith.constant 0 : i32
    return %c0_i32, %c0_i32_0 : i32, i32
  }
}

</mosaic_0001>

<bundles_post_ra>
// kernel: tpu_custom_call.1
= control target key start
LH: loop header
LB: loop body
LE: loop exit
PB: predicated region body
PF: predicated region fallthrough
CT: control target
= control target key end

     0   :  { %8 = vsyncpa [#allocation4], 0  ;;  %s323_s0 = inlined_call_operand.hbm [shape: f32[2,4,16], index: 0, kind: input, shape index: {}]   ;;  %s324_s1 = inlined_call_operand.hbm [shape: f32[4,128], index: 1, kind: input, shape index: {}]   ;;  %s325_s2 = inlined_call_operand.vmem [shape: f32[1,128], index: 2, kind: input, shape index: {}]   ;;  %s326_s3 = inlined_call_operand.hbm [shape: f32[2,128], index: 3, kind: output, shape index: {}]  }
   0x1   :  { %9 = vsyncpa [#allocation7], 0 }
   0x2   :  { %10 = vsyncpa [#allocation5], 0  ;;  %s282_s12 = smov [#allocation3]  }
   0x3   :  { %s16_s13 = sshll.u32 %s282_s12, 4  ;;  %s17_s13 = int_to_ptr.vmem [resolvable:$true] %s16_s13 }
   0x4   :  { %s224_s14 = scalar_lea.vmem %s17_s13, 128  ;;  %p229_p1 = scmp.lt.s32.totalorder %s17_s13, %s17_s13 }
   0x5   :  { %p225_p0 = scmp.ne.s32.totalorder %s17_s13, %s224_s14  ;;  %p230_p2 = scmp.lt.s32.totalorder %s224_s14, %s224_s14 }
   0x7   :  { %p231_p3 = por %p230_p2, %p229_p1 }
   0x9   :  { %p232_p4 = pnand %p231_p3, %p225_p0 }
   0xb   :  { %235 = shalt.err (!%p232_p4)
}
   0xc   :  { %s283_s15 = smov 64   ;;  %s284_s16 = smov 4  }
   0xd   :  { %22 = dma.hbm_to_vmem [thread:$0]  %s323_s0, 128, %s17_s13, [#allocation4], %s283_s15, %s283_s15, %s284_s16  }
   0xe   :  { %s285_s19 = smov [#allocation6]  }
   0xf   :  { %s29_s20 = sshll.u32 %s285_s19, 4  ;;  %s30_s20 = int_to_ptr.vmem [resolvable:$true] %s29_s20 }
  0x10   :  { %s244_s21 = scalar_lea.vmem %s30_s20, 64  ;;  %p249_p6 = scmp.lt.s32.totalorder %s30_s20, %s30_s20 }
  0x11   :  { %p245_p5 = scmp.ne.s32.totalorder %s30_s20, %s244_s21  ;;  %p250_p7 = scmp.lt.s32.totalorder %s244_s21, %s244_s21 }
  0x13   :  { %p251_p8 = por %p250_p7, %p249_p6 }
  0x15   :  { %p252_p9 = pnand %p251_p8, %p245_p5 }
  0x17   :  { %255 = shalt.err (!%p252_p9)
}
  0x18   :  { %32 = dma.hbm_to_vmem [thread:$0]  %s324_s1, 64, %s30_s20, [#allocation7]  }
  0x19   :  { %276 = dma.done.wait [#allocation4], 128  }
  0x1a   :  { %277 = vsyncadd [#allocation4], 4294967168 }
  0x1b   :  { %278 = dma.done.wait [#allocation7], 64  }
  0x1c   :  { %279 = vsyncadd [#allocation7], 4294967232  ;;  %vm50_vm0 = vcmask 125952   ;;  %v48_v0 = vld [vmem:[#allocation3] sm:$0xf]  ;;  %vm45_vm1 = vcmask 25600   ;;  %v59_v6 = vlaneseq }
  0x1d   :  { %v49_v1 = vld [vmem:[#allocation3 + $0x4] sm:$0xf]  ;;  %v51_v2 = vsel %vm50_vm0, %v48_v0, 0.0  ;;  %v286_v4 = vmov 0.0   ;;  %v80_v5 = vld [vmem:[#allocation6] sm:$0xf] }
  0x1e   :  { %52 = vadd.xlane.f32.xlu0 %v51_v2  ;;  %v54_v3 = vsel %vm50_vm0, %v49_v1, 0.0  ;;  %46 = vst.msk [vmem:[#allocation2] sm:$0x3] %vm45_vm1, %v286_v4  ;;  %200 = vmatprep.subr.mxu0 %v286_v4  ;;  %vm92_vm2 = vcmask 1043456   ;;  %vm287_vm3 = vmmov 0   ;;  %v60_v7 = vand.u32 127, %v59_v6 }
  0x1f   :  { %201 = vmatpush3.msk.msra.mxu0 %vm92_vm2, %v80_v5  ;;  %202 = vmatprep.mubr.msk.f32.mxu0 %vm287_vm3, %v286_v4  ;;  %v62_v8 = vshrl.u32 %v59_v6, 7  ;;  %vm69_vm4 = vcmask 1041409   ;;  %vm88_vm5 = vcmask 31744   ;;  %v195_v19 = vld [vmem:[%s325_s2] ss:$0 sm:$0xff]  ;;  %vm166_vm6 = vcmask 1041408  }
  0x20   :  { %s288_s24 = smov [#allocation8]  }
  0x21   :  { %v63_v10 = vsub.s32 %v60_v7, %v62_v8  ;;  %s185_s25 = sshll.u32 %s288_s24, 4  ;;  %s186_s25 = int_to_ptr.vmem [resolvable:$true] %s185_s25 }
  0x22   :  { %55 = vadd.xlane.f32.xlu0 %v54_v3  ;;  %s256_s2 = scalar_lea.vmem %s186_s25, 32  ;;  %p261_p11 = scmp.lt.s32.totalorder %s186_s25, %s186_s25 }
  0x23   :  { %p257_p10 = scmp.ne.s32.totalorder %s186_s25, %s256_s2  ;;  %p262_p12 = scmp.lt.s32.totalorder %s256_s2, %s256_s2 }
  0x25   :  { %v47_v14 = vld [vmem:[#allocation2] sm:$0x3]  ;;  %p263_p13 = por %p262_p12, %p261_p11 }
  0x27   :  { %p264_p0 = pnand %p263_p13, %p257_p10 }
  0xa7   :  { %v53_v9 = vpop.xlane.xlu0 %52 }
  0xa8   :  { %v64_v12 = vrot.slane %v53_v9, %v63_v10 }
  0xab   :  { %v56_v11 = vpop.xlane.xlu0 %55 }
  0xac   :  { %v68_v13 = vrot.slane %v56_v11, %v63_v10 }
  0xae   :  { %v70_v15 = vsel %vm69_vm4, %v68_v13, %v64_v12 }
  0xaf   :  { %v72_v16 = vadd.f32 %v70_v15, %v47_v14 }
  0xb1   :  { %74 = vst.msk [vmem:[#allocation2] sm:$0x3] %vm45_vm1, %v72_v16 }
  0xb8   :  { %v78_v17 = vld [vmem:[#allocation2] sm:$0x3] }
  0xb9   :  { %v79_v18 = vmul.f32 0.0625, %v78_v17 }
  0xbb   :  { %203 = vmatmul.mubr.msk.f32.vlgmr.msra.gmra.mxu0 %vm88_vm5, %v79_v18 }
 0x17b   :  { %v162_v20 = vpop.f32.mrf.mxu0 }
 0x17c   :  { %v163_v21 = vadd.f32 %v195_v19, %v162_v20 }
 0x17d   :  { %v204_v22 = vpop.f32.mrf.mxu0 }
 0x17e   :  { %v167_v23 = vsel %vm166_vm6, %v163_v21, -inf }
 0x17f   :  { %168 = vmax.xlane.f32.xlu1 %v167_v23 }
 0x208   :  { %v169_v24 = vpop.xlane.xlu1 %168 }
 0x209   :  { %v170_v25 = vsub.f32 %v163_v21, %v169_v24 }
 0x20b   :  { %v171_v26 = vmul.f32 1.442695, %v170_v25 }
 0x20d   :  { %212 = vpow2.f32 %v171_v26 }
 0x21a   :  { %v213_v27 = vpop.eup %212 }
 0x21b   :  { %v173_v28 = vsel %vm166_vm6, %v213_v27, 0.0 }
 0x21c   :  { %174 = vadd.xlane.f32.xlu1 %v173_v28 }
 0x2a5   :  { %v175_v29 = vpop.xlane.xlu1 %174 }
 0x2a6   :  { %214 = vrcp.f32 %v175_v29 }
 0x2b3   :  { %v215_v30 = vpop.eup %214 }
 0x2b4   :  { %v177_v31 = vmul.f32 %v215_v30, %v213_v27 }
 0x2b6   :  { %178 = vst [vmem:[#allocation8] sm:$0x3] %v177_v31 }
 0x2b7   :  { %267 = shalt.err (!%p264_p0)
}
 0x2b8   :  { %188 = dma.vmem_to_hbm [thread:$0]  %s186_s25, 32, %s326_s3, [#allocation5]  }
 0x2b9   :  { %280 = dma.done.wait [#allocation5], 32  }
 0x2ba   :  { %281 = vsyncadd [#allocation5], 4294967264 }
 0x2bb   :  { %192 = vsyncpa [#allocation4], 1 }
 0x2bc   :  { %193 = vsyncpa [#allocation7], 1 }
 0x2bd   :  { %194 = vsyncpa [#allocation5], 1 }

</bundles_post_ra>
